<compile_context>
chip_gen: v7x
topology: tpu7x:2x2x1
jax: 0.10.0
libtpu: 0.0.40
codegen_flags: <defaults>
</compile_context>

<pallas_src>
import functools

import jax
import jax.numpy as jnp
from jax import lax
from jax.experimental import pallas as pl
from jax.experimental.pallas import tpu as pltpu

EPS = 1e-8
_DEFAULT_BLOCK_BYTES = 4 * 1024 * 1024   # per-block budget (x2 for double buffering)
_VMEM_LIMIT_BYTES = 32 * 1024 * 1024


def _finalize_loss(feat, o_ref):
    """feat: (N, C) f32 pooled features -> o_ref (1, 1) FedDecorr loss."""
    n, c = feat.shape
    mean = jnp.mean(feat, axis=0, keepdims=True)                      # (1, C)
    xc = feat - mean
    var = jnp.sum(xc * xc, axis=0, keepdims=True) * jnp.float32(1.0 / (n - 1))
    xn = xc * lax.rsqrt(EPS + var)                                    # rsqrt -> EUP slot
    corr = lax.dot_general(                                           # xn^T @ xn on the MXU
        xn, xn, (((0,), (0,)), ((), ())),
        preferred_element_type=jnp.float32,
    )                                                                 # (C, C)
    # sum(off-diag^2) = sum(corr^2) - sum(diag^2); diag_j = sum_n xn[n, j]^2.
    diag = jnp.sum(xn * xn, axis=0, keepdims=True)                    # (1, C)
    sum_corr2 = jnp.sum(corr * corr, axis=(0, 1), keepdims=True)      # (1, 1)
    sum_diag2 = jnp.sum(diag * diag, axis=1, keepdims=True)           # (1, 1)
    scale = jnp.float32(1.0 / (float(c) * float(c - 1)) / float(n))
    o_ref[...] = (sum_corr2 - sum_diag2) * scale


def _feddecorr_pool_kernel(x_ref, o_ref, acc_ref, *, s_total, ts):
    """Grid over the spatial axis: accumulate pooled sums, finalize at the end."""
    s = pl.program_id(0)

    @pl.when(s == 0)
    def _init():
        acc_ref[...] = jnp.zeros_like(acc_ref)

    x = x_ref[...].astype(jnp.float32)                                # (N, C, TS)
    rem = s_total % ts
    if rem != 0:
        # Final block is partial: mask lanes past the true spatial extent.
        lane = lax.broadcasted_iota(jnp.int32, x.shape, 2)
        limit = jnp.where(s == pl.num_programs(0) - 1, rem, ts)
        x = jnp.where(lane < limit, x, jnp.float32(0.0))
    acc_ref[...] += jnp.sum(x, axis=-1)                               # partial spatial sums

    @pl.when(s == pl.num_programs(0) - 1)
    def _fin():
        feat = acc_ref[...] * jnp.float32(1.0 / s_total)              # adaptive_avg_pool2d
        _finalize_loss(feat, o_ref)


def _feddecorr_feat_kernel(x_ref, o_ref):
    """2-D path: (N, C) features, lane-dense, no pooling."""
    _finalize_loss(x_ref[...].astype(jnp.float32), o_ref)


def _choose_ts(n, c, s, itemsize, block_bytes):
    if n * c * s * itemsize <= block_bytes:
        return s                                    # single full-S block (full-dim OK)
    ts = (block_bytes // (n * c * itemsize)) // 128 * 128
    return max(int(ts), 128)                        # lane-aligned tile


def feddecorr_loss(x, *, block_bytes=_DEFAULT_BLOCK_BYTES):
    """Pallas equivalent of FedDecorrLoss().forward(x)."""
    if x.ndim == 4:
        n, c, h, w = x.shape
        s = h * w
    elif x.ndim == 2:
        n, c = x.shape
        s = None
    else:
        raise ValueError("expected 2D or 4D input")

    if n == 1:                     # matches the PyTorch early-return of 0.0
        return jnp.float32(0.0)
    if c < 2:                      # PyTorch: empty off-diagonal .mean() -> nan
        return jnp.float32(jnp.nan)

    if s is None:
        # (N, C): whole matrix as one lane-dense block, no pooling stage.
        out = pl.pallas_call(
            _feddecorr_feat_kernel,
            out_shape=jax.ShapeDtypeStruct((1, 1), jnp.float32),
            in_specs=[pl.BlockSpec(memory_space=pltpu.MemorySpace.VMEM)],
            out_specs=pl.BlockSpec(memory_space=pltpu.MemorySpace.VMEM),
            compiler_params=pltpu.CompilerParams(
                vmem_limit_bytes=_VMEM_LIMIT_BYTES),
        )(x)
        return out[0, 0]

    itemsize = jnp.dtype(x.dtype).itemsize
    ts = _choose_ts(n, c, s, itemsize, block_bytes)
    grid = (pl.cdiv(s, ts),)
    x3 = x.reshape(n, c, s)        # keep native dtype; cast per tile in-kernel

    kernel = functools.partial(_feddecorr_pool_kernel, s_total=s, ts=ts)
    cost = pl.CostEstimate(
        flops=int(n * c * s + 2 * n * c * c + 8 * n * c + 3 * c * c),
        transcendentals=int(c),
        bytes_accessed=int(n * c * s * itemsize + 4),
    )
    # TODO(synk): optional v7x dual-TensorCore split (leading "parallel" grid
    # axis with per-core partial pooled sums) is not implemented; the single
    # reduction axis runs on one TC.
    out = pl.pallas_call(
        kernel,
        out_shape=jax.ShapeDtypeStruct((1, 1), jnp.float32),
        grid_spec=pltpu.PrefetchScalarGridSpec(
            num_scalar_prefetch=0,
            grid=grid,
            in_specs=[pl.BlockSpec((n, c, ts), lambda i: (0, 0, i))],
            out_specs=pl.BlockSpec((1, 1), lambda i: (0, 0)),
            scratch_shapes=[pltpu.VMEM((n, c), jnp.float32)],
        ),
        compiler_params=pltpu.CompilerParams(
            dimension_semantics=("arbitrary",),
            vmem_limit_bytes=_VMEM_LIMIT_BYTES),
        cost_estimate=cost,
    )(x3)
    return out[0, 0]


def _reference(x):
    """Plain-JAX reproduction of the PyTorch forward, for checking."""
    x = x.astype(jnp.float32)
    if x.ndim == 4:
        x = jnp.mean(x, axis=(2, 3))
    n, c = x.shape
    x = x - jnp.mean(x, axis=0, keepdims=True)
    var = jnp.sum(x * x, axis=0, keepdims=True) / (n - 1)
    x = x / jnp.sqrt(EPS + var)
    corr = x.T @ x
    off = corr - jnp.diag(jnp.diag(corr))
    return jnp.sum(off ** 2) / (c * (c - 1)) / n


if __name__ == "__main__":
    # 4-D path, single spatial tile.
    x = jax.random.normal(jax.random.PRNGKey(0), (2, 4, 16, 16), dtype=jnp.float32)
    out = jax.block_until_ready(feddecorr_loss(x))
    ref = _reference(x)
    assert jnp.allclose(out, ref, rtol=1e-4, atol=1e-5), (out, ref)

    # 2-D path (lane-dense (N, C), no pooling).
    x2 = jax.random.normal(jax.random.PRNGKey(1), (8, 32), dtype=jnp.float32)
    out2 = jax.block_until_ready(feddecorr_loss(x2))
    assert jnp.allclose(out2, _reference(x2), rtol=1e-4, atol=1e-5), (out2,)

    # Multi-tile grid path with a partial final tile (forced small block budget).
    x3 = jax.random.normal(jax.random.PRNGKey(2), (4, 8, 20, 20), dtype=jnp.float32)
    out3 = jax.block_until_ready(feddecorr_loss(x3, block_bytes=16 * 1024))
    assert jnp.allclose(out3, _reference(x3), rtol=1e-4, atol=1e-5), (out3,)

    # bf16 input streamed in its native dtype, f32 accumulation in-kernel.
    xb = jax.random.normal(jax.random.PRNGKey(3), (4, 8, 16, 16)).astype(jnp.bfloat16)
    outb = jax.block_until_ready(feddecorr_loss(xb))
    assert jnp.allclose(outb, _reference(xb), rtol=1e-3, atol=1e-4), (outb,)

    print("KERNEL_OK")
</pallas_src>

<mosaic_0001>
module attributes {stable_mosaic.version = 11 : i64} {
  func.func @_feddecorr_pool_kernel(%arg0: i32, %arg1: memref<2x4x256xf32, #tpu.memory_space<vmem>>, %arg2: memref<1x1xf32, #tpu.memory_space<vmem>>, %arg3: memref<2x4xf32, #tpu.memory_space<vmem>>) attributes {dimension_semantics = [#tpu.dimension_semantics<arbitrary>], iteration_bounds = array<i64: 1>, scalar_prefetch = 0 : i64, scratch_operands = 1 : i64, tpu.core_type = #tpu.core_type<tc>, window_params = [{transform_indices = @transform_0, window_bounds = array<i64: 2, 4, 256>}, {pipeline_mode = #tpu.pipeline_mode<synchronous>, transform_indices = @transform_1, window_bounds = array<i64: 1, 1>}]} {
    %c0_i32 = arith.constant 0 : i32
    %0 = arith.cmpi eq, %arg0, %c0_i32 : i32
    %1 = arith.extui %0 : i1 to i32
    %c0_i32_0 = arith.constant 0 : i32
    %2 = arith.cmpi ne, %1, %c0_i32_0 : i32
    scf.if %2 {
      %cst_9 = arith.constant 0.000000e+00 : f32
      %11 = vector.broadcast %cst_9 : f32 to vector<2x4xf32>
      %c0_10 = arith.constant 0 : index
      %c0_11 = arith.constant 0 : index
      %12 = vector.load %arg3[%c0_10, %c0_11] : memref<2x4xf32, #tpu.memory_space<vmem>>, vector<2x4xf32>
      tpu.vector_store %arg3[%c0_10, %c0_11], %11 {strides = array<i32>} : memref<2x4xf32, #tpu.memory_space<vmem>>, vector<2x4xf32>,
    } else {
    }
    %c0 = arith.constant 0 : index
    %c0_1 = arith.constant 0 : index
    %c0_2 = arith.constant 0 : index
    %3 = vector.load %arg1[%c0, %c0_1, %c0_2] : memref<2x4x256xf32, #tpu.memory_space<vmem>>, vector<2x4x256xf32>
    %c0_3 = arith.constant 0 : index
    %c0_4 = arith.constant 0 : index
    %4 = vector.load %arg3[%c0_3, %c0_4] : memref<2x4xf32, #tpu.memory_space<vmem>>, vector<2x4xf32>
    %cst = arith.constant dense<0.000000e+00> : vector<2x4xf32>
    %5 = vector.multi_reduction <add>, %3, %cst [2] : vector<2x4x256xf32> to vector<2x4xf32>
    %6 = arith.addf %4, %5 : vector<2x4xf32>
    %c0_5 = arith.constant 0 : index
    %c0_6 = arith.constant 0 : index
    %7 = vector.load %arg3[%c0_5, %c0_6] : memref<2x4xf32, #tpu.memory_space<vmem>>, vector<2x4xf32>
    tpu.vector_store %arg3[%c0_5, %c0_6], %6 {strides = array<i32>} : memref<2x4xf32, #tpu.memory_space<vmem>>, vector<2x4xf32>,
    %c0_i32_7 = arith.constant 0 : i32
    %8 = arith.cmpi eq, %arg0, %c0_i32_7 : i32
    %9 = arith.extui %8 : i1 to i32
    %c0_i32_8 = arith.constant 0 : i32
    %10 = arith.cmpi ne, %9, %c0_i32_8 : i32
    scf.if %10 {
      %c0_9 = arith.constant 0 : index
      %c0_10 = arith.constant 0 : index
      %11 = vector.load %arg3[%c0_9, %c0_10] : memref<2x4xf32, #tpu.memory_space<vmem>>, vector<2x4xf32>
      %cst_11 = arith.constant 3.906250e-03 : f32
      %12 = vector.broadcast %cst_11 : f32 to vector<2x4xf32>
      %13 = arith.mulf %11, %12 : vector<2x4xf32>
      %cst_12 = arith.constant dense<0.000000e+00> : vector<4xf32>
      %14 = vector.multi_reduction <add>, %13, %cst_12 [0] : vector<2x4xf32> to vector<4xf32>
      %15 = vector.shape_cast %14 : vector<4xf32> to vector<1x4xf32>
      %cst_13 = arith.constant 2.000000e+00 : f32
      %16 = vector.broadcast %cst_13 : f32 to vector<1x4xf32>
      %17 = arith.divf %15, %16 : vector<1x4xf32>
      %18 = vector.broadcast %17 : vector<1x4xf32> to vector<2x4xf32>
      %19 = arith.subf %13, %18 : vector<2x4xf32>
      %20 = arith.mulf %19, %19 : vector<2x4xf32>
      %cst_14 = arith.constant dense<0.000000e+00> : vector<4xf32>
      %21 = vector.multi_reduction <add>, %20, %cst_14 [0] : vector<2x4xf32> to vector<4xf32>
      %22 = vector.shape_cast %21 : vector<4xf32> to vector<1x4xf32>
      %cst_15 = arith.constant 1.000000e+00 : f32
      %23 = vector.broadcast %cst_15 : f32 to vector<1x4xf32>
      %24 = arith.mulf %22, %23 : vector<1x4xf32>
      %cst_16 = arith.constant 9.99999993E-9 : f32
      %25 = vector.broadcast %cst_16 : f32 to vector<1x4xf32>
      %26 = arith.addf %25, %24 : vector<1x4xf32>
      %27 = math.rsqrt %26 : vector<1x4xf32>
      %28 = vector.broadcast %27 : vector<1x4xf32> to vector<2x4xf32>
      %29 = arith.mulf %19, %28 : vector<2x4xf32>
      %cst_17 = arith.constant dense<0.000000e+00> : vector<4x4xf32>
      %30 = tpu.matmul %29, %29, %cst_17 {dimension_numbers = #tpu.dot_dimension_numbers<[0], [0], [1], [1], [0, 1, 1, 1], [], []>} : vector<2x4xf32>, vector<2x4xf32>, vector<4x4xf32> -> vector<4x4xf32>
      %31 = arith.mulf %29, %29 : vector<2x4xf32>
      %cst_18 = arith.constant dense<0.000000e+00> : vector<4xf32>
      %32 = vector.multi_reduction <add>, %31, %cst_18 [0] : vector<2x4xf32> to vector<4xf32>
      %33 = vector.shape_cast %32 : vector<4xf32> to vector<1x4xf32>
      %34 = arith.mulf %30, %30 : vector<4x4xf32>
      %35 = vector.shape_cast %34 : vector<4x4xf32> to vector<1x4x4xf32>
      %cst_19 = arith.constant dense<0.000000e+00> : vector<1xf32>
      %36 = vector.multi_reduction <add>, %35, %cst_19 [1, 2] : vector<1x4x4xf32> to vector<1xf32>
      %37 = vector.shape_cast %36 : vector<1xf32> to vector<1x1x1xf32>
      %38 = vector.extract %37[0, 0, 0] : f32 from vector<1x1x1xf32>
      %39 = vector.broadcast %38 : f32 to vector<1x1xf32>
      %40 = arith.mulf %33, %33 : vector<1x4xf32>
      %cst_20 = arith.constant dense<0.000000e+00> : vector<1xf32>
      %41 = vector.multi_reduction <add>, %40, %cst_20 [1] : vector<1x4xf32> to vector<1xf32>
      %42 = vector.shape_cast %41 : vector<1xf32> to vector<1x1xf32>
      %43 = arith.subf %39, %42 : vector<1x1xf32>
      %cst_21 = arith.constant 0.0416666679 : f32
      %44 = vector.broadcast %cst_21 : f32 to vector<1x1xf32>
      %45 = arith.mulf %43, %44 : vector<1x1xf32>
      %c0_22 = arith.constant 0 : index
      %c0_23 = arith.constant 0 : index
      %46 = vector.load %arg2[%c0_22, %c0_23] : memref<1x1xf32, #tpu.memory_space<vmem>>, vector<1x1xf32>
      tpu.vector_store %arg2[%c0_22, %c0_23], %45 {strides = array<i32>} : memref<1x1xf32, #tpu.memory_space<vmem>>, vector<1x1xf32>,
    } else {
    }
    return
  }
  func.func @transform_0(%arg0: i32) -> (i32, i32, i32) {
    %c0_i32 = arith.constant 0 : i32
    %c0_i32_0 = arith.constant 0 : i32
    %c0_i32_1 = arith.constant 0 : i32
    return %c0_i32, %c0_i32_0, %arg0 : i32, i32, i32
  }
  func.func @transform_1(%arg0: i32) -> (i32, i32) {
    %c0_i32 = arith.constant 0 : i32
    %c0_i32_0 = arith.constant 0 : i32
    %c0_i32_1 = arith.constant 0 : i32
    return %c0_i32, %c0_i32_0 : i32, i32
  }
}

</mosaic_0001>

<bundles_post_ra>
// kernel: tpu_custom_call.1
= control target key start
LH: loop header
LB: loop body
LE: loop exit
PB: predicated region body
PF: predicated region fallthrough
CT: control target
= control target key end

     0   :  { %6 = vsyncpa [#allocation4], 0  ;;  %s362_s0 = inlined_call_operand.hbm [shape: f32[2,4,256], index: 0, kind: input, shape index: {}]   ;;  %s363_s1 = inlined_call_operand.hbm [shape: f32[1,1], index: 1, kind: output, shape index: {}]  }
   0x1   :  { %7 = vsyncpa [#allocation5], 0  ;;  %s317_s6 = smov [#allocation3]   ;;  %s269_s10 = scalar_lea.hbm %s362_s0, 256 }
   0x2   :  { %s13_s7 = sshll.u32 %s317_s6, 4  ;;  %p270_p0 = scmp.ne.s32.totalorder %s362_s0, %s269_s10  ;;  %s14_s7 = int_to_ptr.vmem [resolvable:$true] %s13_s7 }
   0x3   :  { %p273_p1 = scmp.lt.u32.totalorder %s269_s10, %s362_s0 }
   0x5   :  { %p275_p2 = pnand %p273_p1, %p270_p0 }
   0x7   :  { %278 = shalt.err (!%p275_p2)
}
   0x8   :  { %s279_s15 = scalar_lea.vmem %s14_s7, 256  ;;  %p284_p4 = scmp.lt.s32.totalorder %s14_s7, %s14_s7 }
   0x9   :  { %p280_p3 = scmp.ne.s32.totalorder %s14_s7, %s279_s15  ;;  %p285_p5 = scmp.lt.s32.totalorder %s279_s15, %s279_s15 }
   0xb   :  { %p286_p6 = por %p285_p5, %p284_p4 }
   0xd   :  { %p287_p7 = pnand %p286_p6, %p280_p3 }
   0xf   :  { %290 = shalt.err (!%p287_p7)
}
  0x10   :  { %s318_s16 = smov 128   ;;  %s319_s17 = smov 8  }
  0x11   :  { %19 = dma.hbm_to_vmem [thread:$0]  %s362_s0, 256, %s14_s7, [#allocation4], %s318_s16, %s318_s16, %s319_s17  }
  0x12   :  { %313 = dma.done.wait [#allocation4], 256  }
  0x13   :  { %314 = vsyncadd [#allocation4], 4294967040  ;;  %vm38_vm0 = vcmask 1043456   ;;  %v29_v0 = vld [vmem:[#allocation3] sm:$0xff]  ;;  %v30_v1 = vld [vmem:[#allocation3 + $0x8] sm:$0xff]  ;;  %vm27_vm1 = vcmask 25600   ;;  %v51_v11 = vlaneseq }
  0x14   :  { %v34_v2 = vcombine.high %v29_v0, %v29_v0  ;;  %v39_v3 = vsel %vm38_vm0, %v29_v0, 0.0  ;;  %v35_v4 = vcombine.high %v30_v1, %v30_v1  ;;  %v44_v6 = vsel %vm38_vm0, %v30_v1, 0.0  ;;  %s322_s20 = smov [#allocation6]  }
  0x15   :  { %v320_v10 = vmov 0.0   ;;  %vm321_vm2 = vmmov 0   ;;  %v52_v12 = vand.u32 127, %v51_v11  ;;  %v54_v13 = vshrl.u32 %v51_v11, 7  ;;  %s239_s21 = sshll.u32 %s322_s20, 4  ;;  %s240_s21 = int_to_ptr.vmem [resolvable:$true] %s239_s21 }
  0x16   :  { %v40_v5 = vsel %vm38_vm0, %v34_v2, 0.0  ;;  %v45_v7 = vsel %vm38_vm0, %v35_v4, 0.0  ;;  %28 = vst.msk [vmem:[#allocation2] sm:$0x3] %vm27_vm1, %v320_v10  ;;  %252 = vmatprep.subr.mxu0 %v320_v10  ;;  %254 = vmatprep.mubr.msk.f32.mxu0 %vm321_vm2, %v320_v10  ;;  %vm61_vm3 = vcmask 1041409   ;;  %vm129_vm4 = vcmask 1041408   ;;  %p296_p9 = scmp.lt.s32.totalorder %s240_s21, %s240_s21 }
  0x17   :  { %v41_v8 = vadd.f32 %v40_v5, %v39_v3  ;;  %v46_v9 = vadd.f32 %v45_v7, %v44_v6  ;;  %v55_v15 = vsub.s32 %v52_v12, %v54_v13  ;;  %vm225_vm5 = vcmask 31744   ;;  %s291_s22 = scalar_lea.vmem %s240_s21, 16  ;;  %s295_s23 = scalar_lea.vmem %s240_s21, 32 }
  0x18   :  { %vm125_vm6 = vcmask 15360   ;;  %vm212_vm7 = vcmask 27648   ;;  %vm231_vm8 = vcmask 0   ;;  %p292_p8 = scmp.ne.s32.totalorder %s240_s21, %s291_s22  ;;  %p297_p10 = scmp.lt.s32.totalorder %s295_s23, %s291_s22 }
  0x19   :  { %42 = vadd.xlane.f32.xlu0 %v41_v8 }
  0x1a   :  { %p298_p11 = por %p297_p10, %p296_p9 }
  0x1c   :  { %p299_p12 = pnand %p298_p11, %p292_p8 }
  0x1d   :  { %47 = vadd.xlane.f32.xlu0 %v46_v9  ;;  %v31_v19 = vld [vmem:[#allocation2] sm:$0x3] }
  0xa6   :  { %v43_v14 = vpop.xlane.xlu0 %42 }
  0xa7   :  { %v56_v17 = vrot.slane %v43_v14, %v55_v15 }
  0xaa   :  { %v48_v16 = vpop.xlane.xlu0 %47 }
  0xab   :  { %v60_v18 = vrot.slane %v48_v16, %v55_v15 }
  0xad   :  { %v62_v20 = vsel %vm61_vm3, %v60_v18, %v56_v17 }
  0xae   :  { %v64_v21 = vadd.f32 %v62_v20, %v31_v19 }
  0xb0   :  { %66 = vst.msk [vmem:[#allocation2] sm:$0x3] %vm27_vm1, %v64_v21 }
  0xb7   :  { %v70_v22 = vld [vmem:[#allocation2] sm:$0x3] }
  0xb8   :  { %v71_v23 = vmul.f32 0.00390625, %v70_v22 }
  0xba   :  { %v72_v24 = vsel %vm27_vm1, %v71_v23, 0.0 }
  0xbb   :  { %v73_v25 = vrot.slane %v72_v24, 4 }
  0xbd   :  { %v74_v26 = vadd.f32 %v73_v25, %v72_v24 }
  0xbf   :  { %v75_v27 = vrot.slane %v74_v26, 2 }
  0xc1   :  { %v76_v28 = vadd.f32 %v75_v27, %v74_v26 }
  0xc3   :  { %v77_v29 = vrot.slane %v76_v28, 1 }
  0xc5   :  { %v78_v30 = vadd.f32 %v77_v29, %v76_v28 }
  0xc7   :  { %v80_v31 = vmul.f32 0.5, %v78_v30 }
  0xc9   :  { %v81_v32 = vsub.f32 %v71_v23, %v80_v31 }
  0xcb   :  { %v82_v33 = vmul.f32 %v81_v32, %v81_v32 }
  0xcd   :  { %v83_v34 = vsel %vm27_vm1, %v82_v33, 0.0 }
  0xce   :  { %v84_v35 = vrot.slane %v83_v34, 4 }
  0xd0   :  { %v85_v36 = vadd.f32 %v84_v35, %v83_v34 }
  0xd2   :  { %v86_v37 = vrot.slane %v85_v36, 2 }
  0xd4   :  { %v87_v38 = vadd.f32 %v86_v37, %v85_v36 }
  0xd6   :  { %v88_v39 = vrot.slane %v87_v38, 1 }
  0xd8   :  { %v89_v40 = vadd.f32 %v88_v39, %v87_v38 }
  0xda   :  { %v90_v41 = vadd.f32 1e-08, %v89_v40 }
  0xdc   :  { %267 = vrsqrt.f32 %v90_v41 }
  0xe6   :  { %v268_v42 = vpop.eup %267 }
  0xe7   :  { %v92_v43 = vmul.f32 %v268_v42, %v81_v32 }
  0xe9   :  { %93 = vxpose.xlu1.b32.start.end [1/1] (short) (narrow) %v92_v43, 8  ;;  %v203_v44 = vmul.f32 %v92_v43, %v92_v43  ;;  %253 = vmatpush3.msk.msra.mxu0 %vm129_vm4, %v92_v43 }
  0xeb   :  { %v204_v45 = vsel %vm27_vm1, %v203_v44, 0.0 }
  0xec   :  { %v205_v46 = vrot.slane %v204_v45, 4 }
  0xee   :  { %v206_v47 = vadd.f32 %v205_v46, %v204_v45 }
  0xf0   :  { %v207_v48 = vrot.slane %v206_v47, 2 }
  0xf2   :  { %v208_v49 = vadd.f32 %v207_v48, %v206_v47 }
  0xf4   :  { %v209_v50 = vrot.slane %v208_v49, 1 }
  0xf6   :  { %v210_v51 = vadd.f32 %v209_v50, %v208_v49 }
  0xf8   :  { %v224_v52 = vmul.f32 %v210_v51, %v210_v51 }
  0xfa   :  { %v226_v53 = vsel %vm225_vm5, %v224_v52, 0.0 }
  0xfb   :  { %227 = vadd.xlane.f32.xlu0 %v226_v53 }
 0x169   :  { %v109_v54 = vpop.trf.xlu1 }
 0x16a   :  { %255 = vmatmul.mubr.msk.f32.vlgmr.msra.gmra.mrb[0].mxu0 %vm125_vm6, %v109_v54 }
 0x188   :  { %v228_v2 = vpop.xlane.xlu0 %227 }
 0x23d   :  { %v199_v55 = vpop.f32.mrb[0].mxu0 }
 0x23e   :  { %v211_v56 = vmul.f32 %v199_v55, %v199_v55  ;;  %v256_v57 = vpop.f32.mrb[1].mxu0 }
 0x240   :  { %v213_v58 = vsel %vm212_vm7, %v211_v56, 0.0 }
 0x241   :  { %214 = vadd.xlane.f32.xlu1 %v213_v58 }
 0x2ce   :  { %v215_v59 = vpop.xlane.xlu1 %214 }
 0x2cf   :  { %v216_v60 = vrot.slane %v215_v59, 4 }
 0x2d1   :  { %v217_v61 = vadd.f32 %v216_v60, %v215_v59 }
 0x2d3   :  { %v218_v62 = vrot.slane %v217_v61, 2 }
 0x2d5   :  { %v219_v63 = vadd.f32 %v218_v62, %v217_v61 }
 0x2d7   :  { %v220_v0 = vrot.slane %v219_v63, 1 }
 0x2d9   :  { %v221_v1 = vadd.f32 %v220_v0, %v219_v63 }
 0x2db   :  { %257 = vpush %v221_v1 }
 0x30c   :  { %s258_s0 = spop %257 }
 0x30d   :  { %v223_v3 = vstv %s258_s0 }
 0x30e   :  { %v229_v4 = vsub.f32 %v223_v3, %v228_v2 }
 0x310   :  { %v230_v5 = vmul.f32 0.041666668, %v229_v4 }
 0x312   :  { %232 = vst.msk [vmem:[#allocation6] sm:$0x1] %vm231_vm8, %v230_v5 }
 0x313   :  { %302 = shalt.err (!%p299_p12)
}
 0x314   :  { %s303_s26 = scalar_lea.hbm %s363_s1, 16 }
 0x315   :  { %p304_p13 = scmp.ne.s32.totalorder %s363_s1, %s303_s26  ;;  %p307_p0 = scmp.lt.u32.totalorder %s303_s26, %s363_s1 }
 0x317   :  { %p309_p1 = pnand %p307_p0, %p304_p13 }
 0x319   :  { %312 = shalt.err (!%p309_p1)
}
 0x31a   :  { %242 = dma.vmem_to_hbm [thread:$0]  %s240_s21, 16, %s363_s1, [#allocation5]  }
 0x31b   :  { %315 = dma.done.wait [#allocation5], 16  }
 0x31c   :  { %316 = vsyncadd [#allocation5], 4294967280 }
 0x31d   :  { %246 = vsyncpa [#allocation4], 1 }
 0x31e   :  { %247 = vsyncpa [#allocation5], 1 }

</bundles_post_ra>
